<compile_context>
chip_gen: v7x
topology: tpu7x:2x2x1
jax: 0.10.0
libtpu: 0.0.40
codegen_flags: <defaults>
</compile_context>

<pallas_src>
import functools

import jax
import jax.numpy as jnp
from jax import lax
from jax.experimental import pallas as pl
from jax.experimental.pallas import tpu as pltpu


def _embed_ln_kernel(ids_ref, table_hbm, gamma_ref, beta_ref, out_ref,
                     rows_vmem, dma_sem, *, eps, d_valid, tile_rows):
    # ids_ref:    (N_pad,)        int32  (SMEM, scalar-prefetched token ids)
    # table_hbm:  (V, Dp)         f32    (HBM, memory_space=pl.ANY; row 0 = padding_idx)
    # gamma_ref:  (1, Dp)         f32    (VMEM)
    # beta_ref:   (1, Dp)         f32    (VMEM)
    # out_ref:    (tile_rows, Dp) f32    (VMEM output tile)
    # rows_vmem:  (tile_rows, Dp) f32    (VMEM scratch: gathered embedding rows)
    # dma_sem:    (1,) DMA semaphore
    i = pl.program_id(0)
    base = i * tile_rows

    # --- DMA gather: one row copy per token id (HBM -> VMEM). -----------------
    def _start(r, carry):
        tok = ids_ref[base + r]
        pltpu.make_async_copy(
            table_hbm.at[pl.ds(tok, 1), :],
            rows_vmem.at[pl.ds(r, 1), :],
            dma_sem.at[0],
        ).start()
        return carry

    lax.fori_loop(0, tile_rows, _start, 0)

    def _wait(r, carry):
        # Source index is irrelevant for wait(); only sizes/dst/sem matter.
        pltpu.make_async_copy(
            table_hbm.at[pl.ds(0, 1), :],
            rows_vmem.at[pl.ds(r, 1), :],
            dma_sem.at[0],
        ).wait()
        return carry

    lax.fori_loop(0, tile_rows, _wait, 0)

    emb = rows_vmem[...]                                    # (tile_rows, Dp) f32
    dp = emb.shape[-1]
    inv_d = 1.0 / float(d_valid)

    # --- LayerNorm over the (real) embedding dim, eps = PyTorch default. ------
    if d_valid == dp:
        mean = jnp.sum(emb, axis=-1, keepdims=True) * inv_d
        centered = emb - mean
    else:
        # Padded columns of the table are zeros, so the sum already equals the
        # sum over real columns; only the centered values need masking.
        lane = lax.broadcasted_iota(jnp.int32, emb.shape, 1)
        mask = lane < d_valid
        mean = jnp.sum(emb, axis=-1, keepdims=True) * inv_d
        centered = jnp.where(mask, emb - mean, 0.0)

    var = jnp.sum(centered * centered, axis=-1, keepdims=True) * inv_d
    inv_std = lax.rsqrt(var + eps)
    out = centered * inv_std * gamma_ref[...] + beta_ref[...]

    # Dropout: inference mode -> identity.
    out_ref[...] = out.astype(out_ref.dtype)


def embedding_forward(x_ids, table, gamma, beta, *, eps=1e-5, tile_rows=128):
    """x_ids: (B, S) int32 -> (B, S, D) float32."""
    B, S = x_ids.shape
    V, D = table.shape
    N = B * S

    # Lane-dense output: pad D up to a multiple of 128 with zero columns.
    Dp = max(128, ((D + 127) // 128) * 128)
    # Pad the row count up to a multiple of tile_rows (extra rows use padding_idx=0).
    N_pad = ((N + tile_rows - 1) // tile_rows) * tile_rows

    ids_flat = x_ids.reshape(N).astype(jnp.int32)
    if N_pad != N:
        ids_flat = jnp.concatenate(
            [ids_flat, jnp.zeros((N_pad - N,), jnp.int32)])

    table_p = table.astype(jnp.float32)
    if Dp != D:
        table_p = jnp.pad(table_p, ((0, 0), (0, Dp - D)))
    gamma_p = jnp.pad(gamma.astype(jnp.float32), (0, Dp - D)).reshape(1, Dp)
    beta_p = jnp.pad(beta.astype(jnp.float32), (0, Dp - D)).reshape(1, Dp)

    grid = (N_pad // tile_rows,)
    kernel = functools.partial(
        _embed_ln_kernel, eps=eps, d_valid=D, tile_rows=tile_rows)

    out_flat = pl.pallas_call(
        kernel,
        out_shape=jax.ShapeDtypeStruct((N_pad, Dp), jnp.float32),
        grid_spec=pltpu.PrefetchScalarGridSpec(
            num_scalar_prefetch=1,                       # ids -> SMEM
            grid=grid,
            in_specs=[
                pl.BlockSpec(memory_space=pl.ANY),       # table stays in HBM
                pl.BlockSpec((1, Dp), lambda i, ids: (0, 0)),   # gamma (invariant)
                pl.BlockSpec((1, Dp), lambda i, ids: (0, 0)),   # beta  (invariant)
            ],
            out_specs=pl.BlockSpec((tile_rows, Dp), lambda i, ids: (i, 0)),
            scratch_shapes=[
                pltpu.VMEM((tile_rows, Dp), jnp.float32),       # gathered rows
                pltpu.SemaphoreType.DMA((1,)),
            ],
        ),
        compiler_params=pltpu.CompilerParams(
            dimension_semantics=("parallel",)),
    )(ids_flat, table_p, gamma_p, beta_p)

    return out_flat[:N, :D].reshape(B, S, D)


def _reference(x_ids, table, gamma, beta, eps=1e-5):
    emb = table[x_ids]                                   # (B, S, D)
    mean = emb.mean(-1, keepdims=True)
    var = ((emb - mean) ** 2).mean(-1, keepdims=True)
    return (emb - mean) / jnp.sqrt(var + eps) * gamma + beta


if __name__ == "__main__":
    # Small shapes consistent with the module: batch=2, seq=8, embed_dim=32, vocab=64.
    B, S, D, V = 2, 8, 32, 64
    key = jax.random.PRNGKey(0)
    k_tab, k_ids = jax.random.split(key)

    # nn.Embedding ~ N(0,1) with padding_idx=0 row zeroed; nn.LayerNorm: w=1, b=0.
    table = jax.random.normal(k_tab, (V, D), dtype=jnp.float32)
    table = table.at[0].set(0.0)
    gamma = jnp.ones((D,), jnp.float32)
    beta = jnp.zeros((D,), jnp.float32)

    # Token ids, include some padding_idx=0 tokens.
    x_ids = jax.random.randint(k_ids, (B, S), 0, V, dtype=jnp.int32)
    x_ids = x_ids.at[0, 0].set(0)

    out = embedding_forward(x_ids, table, gamma, beta)
    out = jax.block_until_ready(out)

    ref = _reference(x_ids, table, gamma, beta)
    assert out.shape == (B, S, D)
    assert jnp.allclose(out, ref, atol=1e-5, rtol=1e-5), "mismatch vs reference"
    print("KERNEL_OK")
</pallas_src>

<mosaic_0001>
module attributes {stable_mosaic.version = 11 : i64} {
  func.func @_embed_ln_kernel(%arg0: i32, %arg1: memref<128xi32, #tpu.memory_space<smem>>, %arg2: memref<64x128xf32, #tpu.memory_space<any>>, %arg3: memref<1x128xf32, #tpu.memory_space<vmem>>, %arg4: memref<1x128xf32, #tpu.memory_space<vmem>>, %arg5: memref<128x128xf32, #tpu.memory_space<vmem>>, %arg6: memref<128x128xf32, #tpu.memory_space<vmem>>, %arg7: memref<1x!tpu.dma_semaphore, #tpu.memory_space<semaphore_mem>>) attributes {dimension_semantics = [#tpu.dimension_semantics<parallel>], iteration_bounds = array<i64: 1>, scalar_prefetch = 1 : i64, scratch_operands = 2 : i64, tpu.core_type = #tpu.core_type<tc>, window_params = [{}, {pipeline_mode = #tpu.pipeline_mode<synchronous>, transform_indices = @transform_1, window_bounds = array<i64: 1, 128>}, {pipeline_mode = #tpu.pipeline_mode<synchronous>, transform_indices = @transform_2, window_bounds = array<i64: 1, 128>}, {transform_indices = @transform_3, window_bounds = array<i64: 128, 128>}]} {
    %c128_i32 = arith.constant 128 : i32
    %0 = arith.muli %arg0, %c128_i32 : i32
    %c0_i32 = arith.constant 0 : i32
    %c128_i32_0 = arith.constant 128 : i32
    %1 = arith.addi %c0_i32, %c128_i32_0 : i32
    %c1_i32 = arith.constant 1 : i32
    scf.for %arg8 = %c0_i32 to %1 step %c1_i32  : i32 {
      %32 = arith.addi %0, %arg8 : i32
      %33 = arith.index_cast %32 : i32 to index
      %34 = memref.load %arg1[%33] : memref<128xi32, #tpu.memory_space<smem>>
      %c0_i32_18 = arith.constant 0 : i32
      %c0_i32_19 = arith.constant 0 : i32
      %35 = tpu.memref_slice %arg2[%34, %c0_i32_19] : memref<64x128xf32, #tpu.memory_space<any>> -> memref<1x128xf32, #tpu.memory_space<any>>
      %c0_i32_20 = arith.constant 0 : i32
      %36 = tpu.memref_slice %arg6[%arg8, %c0_i32_20] : memref<128x128xf32, #tpu.memory_space<vmem>> -> memref<1x128xf32, #tpu.memory_space<vmem>>
      %37 = tpu.memref_slice %arg7[%c0_i32_18] : memref<1x!tpu.dma_semaphore, #tpu.memory_space<semaphore_mem>> -> memref<1x!tpu.dma_semaphore, #tpu.memory_space<semaphore_mem>>
      %38 = tpu.memref_squeeze %37 : memref<1x!tpu.dma_semaphore, #tpu.memory_space<semaphore_mem>> -> memref<!tpu.dma_semaphore, #tpu.memory_space<semaphore_mem>>
      tpu.enqueue_dma source(%35 : memref<1x128xf32, #tpu.memory_space<any>>) target(%36 : memref<1x128xf32, #tpu.memory_space<vmem>>) target_semaphore(%38 : memref<!tpu.dma_semaphore, #tpu.memory_space<semaphore_mem>>)
    }
    %c128_i32_1 = arith.constant 128 : i32
    %c0_i32_2 = arith.constant 0 : i32
    %c128_i32_3 = arith.constant 128 : i32
    %2 = arith.addi %c0_i32_2, %c128_i32_3 : i32
    %c1_i32_4 = arith.constant 1 : i32
    scf.for %arg8 = %c0_i32_2 to %2 step %c1_i32_4  : i32 {
      %c0_i32_18 = arith.constant 0 : i32
      %c0_i32_19 = arith.constant 0 : i32
      %c0_i32_20 = arith.constant 0 : i32
      %32 = tpu.memref_slice %arg2[%c0_i32_19, %c0_i32_20] : memref<64x128xf32, #tpu.memory_space<any>> -> memref<1x128xf32, #tpu.memory_space<any>>
      %c0_i32_21 = arith.constant 0 : i32
      %33 = tpu.memref_slice %arg6[%arg8, %c0_i32_21] : memref<128x128xf32, #tpu.memory_space<vmem>> -> memref<1x128xf32, #tpu.memory_space<vmem>>
      %34 = tpu.memref_slice %arg7[%c0_i32_18] : memref<1x!tpu.dma_semaphore, #tpu.memory_space<semaphore_mem>> -> memref<1x!tpu.dma_semaphore, #tpu.memory_space<semaphore_mem>>
      %35 = tpu.memref_squeeze %34 : memref<1x!tpu.dma_semaphore, #tpu.memory_space<semaphore_mem>> -> memref<!tpu.dma_semaphore, #tpu.memory_space<semaphore_mem>>
      tpu.wait_dma2 semaphore(%35 : memref<!tpu.dma_semaphore, #tpu.memory_space<semaphore_mem>>) src(%32 : memref<1x128xf32, #tpu.memory_space<any>>) dst(%33 : memref<1x128xf32, #tpu.memory_space<vmem>>)
    }
    %c128_i32_5 = arith.constant 128 : i32
    %c0 = arith.constant 0 : index
    %c0_6 = arith.constant 0 : index
    %3 = vector.load %arg6[%c0, %c0_6] : memref<128x128xf32, #tpu.memory_space<vmem>>, vector<128x128xf32>
    %4 = tpu.iota {dimensions = array<i32: 1>} : vector<128x128xi32>
    %c32_i32 = arith.constant 32 : i32
    %5 = vector.broadcast %c32_i32 : i32 to vector<128x128xi32>
    %6 = arith.cmpi slt, %4, %5 : vector<128x128xi32>
    %cst = arith.constant dense<0.000000e+00> : vector<128xf32>
    %7 = vector.multi_reduction <add>, %3, %cst [1] : vector<128x128xf32> to vector<128xf32>
    %8 = vector.shape_cast %7 : vector<128xf32> to vector<128x1xf32>
    %cst_7 = arith.constant 3.125000e-02 : f32
    %9 = vector.broadcast %cst_7 : f32 to vector<128x1xf32>
    %10 = arith.mulf %8, %9 : vector<128x1xf32>
    %11 = vector.broadcast %10 : vector<128x1xf32> to vector<128x128xf32>
    %12 = arith.subf %3, %11 : vector<128x128xf32>
    %cst_8 = arith.constant 0.000000e+00 : f32
    %13 = vector.broadcast %cst_8 : f32 to vector<128x128xf32>
    %14 = arith.select %6, %12, %13 : vector<128x128xi1>, vector<128x128xf32>
    %15 = arith.mulf %14, %14 : vector<128x128xf32>
    %cst_9 = arith.constant dense<0.000000e+00> : vector<128xf32>
    %16 = vector.multi_reduction <add>, %15, %cst_9 [1] : vector<128x128xf32> to vector<128xf32>
    %17 = vector.shape_cast %16 : vector<128xf32> to vector<128x1xf32>
    %cst_10 = arith.constant 3.125000e-02 : f32
    %18 = vector.broadcast %cst_10 : f32 to vector<128x1xf32>
    %19 = arith.mulf %17, %18 : vector<128x1xf32>
    %cst_11 = arith.constant 9.99999974E-6 : f32
    %20 = vector.broadcast %cst_11 : f32 to vector<128x1xf32>
    %21 = arith.addf %19, %20 : vector<128x1xf32>
    %22 = math.rsqrt %21 : vector<128x1xf32>
    %23 = vector.broadcast %22 : vector<128x1xf32> to vector<128x128xf32>
    %24 = arith.mulf %14, %23 : vector<128x128xf32>
    %c0_12 = arith.constant 0 : index
    %c0_13 = arith.constant 0 : index
    %25 = vector.load %arg3[%c0_12, %c0_13] : memref<1x128xf32, #tpu.memory_space<vmem>>, vector<1x128xf32>
    %26 = vector.broadcast %25 : vector<1x128xf32> to vector<128x128xf32>
    %27 = arith.mulf %24, %26 : vector<128x128xf32>
    %c0_14 = arith.constant 0 : index
    %c0_15 = arith.constant 0 : index
    %28 = vector.load %arg4[%c0_14, %c0_15] : memref<1x128xf32, #tpu.memory_space<vmem>>, vector<1x128xf32>
    %29 = vector.broadcast %28 : vector<1x128xf32> to vector<128x128xf32>
    %30 = arith.addf %27, %29 : vector<128x128xf32>
    %c0_16 = arith.constant 0 : index
    %c0_17 = arith.constant 0 : index
    %31 = vector.load %arg5[%c0_16, %c0_17] : memref<128x128xf32, #tpu.memory_space<vmem>>, vector<128x128xf32>
    tpu.vector_store %arg5[%c0_16, %c0_17], %30 {strides = array<i32>} : memref<128x128xf32, #tpu.memory_space<vmem>>, vector<128x128xf32>,
    return
  }
  func.func @transform_1(%arg0: i32, %arg1: memref<128xi32, #tpu.memory_space<smem>>) -> (i32, i32) {
    %c0_i32 = arith.constant 0 : i32
    %c0_i32_0 = arith.constant 0 : i32
    %c0_i32_1 = arith.constant 0 : i32
    return %c0_i32, %c0_i32_0 : i32, i32
  }
  func.func @transform_2(%arg0: i32, %arg1: memref<128xi32, #tpu.memory_space<smem>>) -> (i32, i32) {
    %c0_i32 = arith.constant 0 : i32
    %c0_i32_0 = arith.constant 0 : i32
    %c0_i32_1 = arith.constant 0 : i32
    return %c0_i32, %c0_i32_0 : i32, i32
  }
  func.func @transform_3(%arg0: i32, %arg1: memref<128xi32, #tpu.memory_space<smem>>) -> (i32, i32) {
    %c0_i32 = arith.constant 0 : i32
    %c0_i32_0 = arith.constant 0 : i32
    return %arg0, %c0_i32 : i32, i32
  }
}

</mosaic_0001>

<bundles_post_ra>
// kernel: tpu_custom_call.1
= control target key start
LH: loop header
LB: loop body
LE: loop exit
PB: predicated region body
PF: predicated region fallthrough
CT: control target
= control target key end

     0   :  { %s762_s0 = inlined_call_operand.hbm [shape: s32[128], index: 0, kind: input, shape index: {}]   ;;  %s763_s1 = inlined_call_operand.hbm [shape: f32[64,128], index: 1, kind: input, shape index: {}]   ;;  %s764_s2 = inlined_call_operand.vmem [shape: f32[1,128], index: 2, kind: input, shape index: {}]   ;;  %s765_s3 = inlined_call_operand.vmem [shape: f32[1,128], index: 3, kind: input, shape index: {}]   ;;  %s766_s4 = inlined_call_operand.hbm [shape: f32[128,128], index: 4, kind: output, shape index: {}]  }
   0x1   :  { %s414_s17 = scalar_lea.hbm %s762_s0, 16 }
   0x2   :  { %p415_p0 = scmp.ne.s32.totalorder %s762_s0, %s414_s17  ;;  %p418_p1 = scmp.lt.u32.totalorder %s414_s17, %s762_s0 }
   0x4   :  { %p420_p2 = pnand %p418_p1, %p415_p0 }
   0x6   :  { %423 = shalt.err (!%p420_p2)  }
   0x7   :  { %s492_s22 = smov [#allocation5]  }
   0x8   :  { %10 = dma.hbm_to_smem %s762_s0, 16, %s492_s22, [#allocation4] }
   0x9   :  { %478 = dma.done.wait [#allocation4], 16 }
   0xa   :  { %479 = vsyncadd [#allocation4], 4294967280 }
   0xb   :  { %12 = sfence }
   0xc   :  { %13 = vsyncpa [#allocation7], 0  ;;  %s534_s25 = smov 0  }
   0xd LB: > { %s26_s26 = sld [smem:[#allocation5 + %s486_s25]]  ;;  %s29_s27 = scalar_lea.vmem [#allocation2], %s486_s25  ;;  %s486_s25 = sphi %s534_s25, %s24_s25  }
   0xe   : > { %s37_s28 = sshll.u32 %s29_s27, 4  ;;  %s426_s9 = scalar_lea.hbm %s763_s1, 1024  ;;  %s38_s28 = int_to_ptr.vmem [resolvable:$true] %s37_s28 }
  0x13   : > { %s358_s29 = sshll.u32 %s26_s26, 4 }
  0x14   : > { %s28_s5 = scalar_lea.hbm %s763_s1, %s358_s29 }
  0x15   : > { %s424_s6 = scalar_lea.hbm %s28_s5, 16  ;;  %p427_p4 = scmp.lt.u32.totalorder %s28_s5, %s763_s1 }
  0x16   : > { %p425_p3 = scmp.ne.s32.totalorder %s28_s5, %s424_s6  ;;  %p428_p5 = scmp.lt.u32.totalorder %s426_s9, %s424_s6 }
  0x17   : > { %p430_p7 = scmp.lt.u32.totalorder %s424_s6, %s28_s5 }
  0x18   : > { %p429_p6 = por %p428_p5, %p427_p4 }
  0x1a   : > { %p431_p8 = por %p430_p7, %p429_p6 }
  0x1c   : > { %p432_p9 = pnand %p431_p8, %p425_p3 }
  0x1e   : > { %435 = shalt.err (!%p432_p9)  }
  0x1f   : > { %s436_s12 = scalar_lea.vmem %s38_s28, 16  ;;  %s493_s13 = smov [#allocation2]  }
  0x20   : > { %p437_p10 = scmp.ne.s32.totalorder %s38_s28, %s436_s12  ;;  %s438_s14 = sshll.u32 %s493_s13, 4  ;;  %s439_s14 = int_to_ptr.vmem [resolvable:$false] %s438_s14 }
  0x21   : > { %s440_s15 = scalar_lea.vmem %s439_s14, 2048  ;;  %p441_p11 = scmp.lt.s32.totalorder %s38_s28, %s439_s14 }
  0x22   : > { %p442_p12 = scmp.lt.s32.totalorder %s440_s15, %s436_s12 }
  0x24   : > { %p443_p13 = por %p442_p12, %p441_p11 }
  0x26   : > { %p444_p0 = pnand %p443_p13, %p437_p10 }
  0x28   : > { %447 = shalt.err (!%p444_p0)  }
  0x29   : > { %40 = dma.hbm_to_vmem [thread:$0]  %s28_s5, 16, %s38_s28, [#allocation3] }
  0x2a   : > { %s24_s25 = sadd.s32 1, %s486_s25  }
  0x2b   : > { %p21_p1 = scmp.ge.s32.totalorder %s24_s25, 128  }
  0x2c   :  { %s488_s16 = smov (%p21_p1), 0  }
  0x2d   :  { %23 = sbr.rel (!%p21_p1) target bundleno = 13 (0xd), region = 48 }
  0x34 LB: > { %480 = dma.done.wait [#allocation3], 16  ;;  %s490_s16 = sphi %s488_s16, %s46_s16  }
  0x35   : > { %481 = vsyncadd [#allocation3], 4294967280  ;;  %s46_s16 = sadd.s32 1, %s490_s16  }
  0x36   : > { %p43_p2 = scmp.ge.s32.totalorder %s46_s16, 128  }
  0x37   :  { %v50_v0 = vld [vmem:[#allocation2] sm:$0xff] (%p43_p2)  ;;  %v52_v1 = vld [vmem:[#allocation2 + $0x10] sm:$0xff] (%p43_p2)  ;;  %v51_v2 = vld [vmem:[#allocation2 + $0x8] sm:$0xff] (%p43_p2)  ;;  %v66_v16 = vlaneseq (%p43_p2) }
  0x38   :  { %45 = sbr.rel (!%p43_p2) target bundleno = 52 (0x34), region = 59  ;;  %69 = vadd.xlane.f32.xlu0 (%p43_p2), %v50_v0  ;;  %73 = vadd.xlane.f32.xlu1 (%p43_p2), %v52_v1  ;;  %v53_v3 = vld [vmem:[#allocation2 + $0x18] sm:$0xff] (%p43_p2)  ;;  %v54_v4 = vld [vmem:[#allocation2 + $0x20] sm:$0xff] (%p43_p2)  ;;  %v55_v5 = vld [vmem:[#allocation2 + $0x28] sm:$0xff] (%p43_p2) }
  0x39   :  { %v553_v6 = vld [vmem:[#allocation2 + $0x30] sm:$0xff] (%p43_p2)  ;;  %v555_v7 = vld [vmem:[#allocation2 + $0x38] sm:$0xff] (%p43_p2)  ;;  %v559_v8 = vld [vmem:[#allocation2 + $0x40] sm:$0xff] (%p43_p2)  ;;  %v583_v17 = vand.u32 (%p43_p2), 127, %v66_v16 }
  0x3a   :  { %v561_v9 = vld [vmem:[#allocation2 + $0x48] sm:$0xff] (%p43_p2)  ;;  %v565_v10 = vld [vmem:[#allocation2 + $0x50] sm:$0xff] (%p43_p2)  ;;  %v567_v11 = vld [vmem:[#allocation2 + $0x58] sm:$0xff] (%p43_p2) }
  0x3b   :  { %v571_v12 = vld [vmem:[#allocation2 + $0x60] sm:$0xff] (%p43_p2)  ;;  %v573_v13 = vld [vmem:[#allocation2 + $0x68] sm:$0xff] (%p43_p2)  ;;  %v577_v14 = vld [vmem:[#allocation2 + $0x70] sm:$0xff] (%p43_p2)  ;;  %vm68_vm0 = vcmp.lt.s32.totalorder (%p43_p2), %v583_v17, 32 }
  0x3c   :  { %71 = vadd.xlane.f32.xlu0 (%p43_p2), %v51_v2  ;;  %75 = vadd.xlane.f32.xlu1 (%p43_p2), %v53_v3  ;;  %v579_v15 = vld [vmem:[#allocation2 + $0x78] sm:$0xff] (%p43_p2) }
  0x40   :  { %77 = vadd.xlane.f32.xlu0 %v54_v4  ;;  %79 = vadd.xlane.f32.xlu1 %v55_v5 }
  0x44   :  { %81 = vadd.xlane.f32.xlu0 %v553_v6  ;;  %83 = vadd.xlane.f32.xlu1 %v555_v7 }
  0x48   :  { %85 = vadd.xlane.f32.xlu0 %v559_v8  ;;  %87 = vadd.xlane.f32.xlu1 %v561_v9 }
  0x4c   :  { %89 = vadd.xlane.f32.xlu0 %v565_v10  ;;  %91 = vadd.xlane.f32.xlu1 %v567_v11 }
  0x50   :  { %93 = vadd.xlane.f32.xlu0 %v571_v12  ;;  %95 = vadd.xlane.f32.xlu1 %v573_v13 }
  0x54   :  { %97 = vadd.xlane.f32.xlu0 %v577_v14  ;;  %99 = vadd.xlane.f32.xlu1 %v579_v15 }
  0xc5   :  { %v70_v18 = vpop.xlane.xlu0 %69  ;;  %v74_v19 = vpop.xlane.xlu1 %73 }
  0xc6   :  { %v101_v20 = vmul.f32 0.03125, %v70_v18  ;;  %v103_v21 = vmul.f32 0.03125, %v74_v19 }
  0xc8   :  { %v117_v22 = vsub.f32 %v50_v0, %v101_v20  ;;  %v119_v23 = vsub.f32 %v52_v1, %v103_v21 }
  0xc9   :  { %v72_v24 = vpop.xlane.xlu0 %71  ;;  %v76_v25 = vpop.xlane.xlu1 %75 }
  0xca   :  { %v102_v26 = vmul.f32 0.03125, %v72_v24  ;;  %v104_v27 = vmul.f32 0.03125, %v76_v25  ;;  %v588_v28 = vsel %vm68_vm0, %v117_v22, 0.0  ;;  %v592_v29 = vsel %vm68_vm0, %v119_v23, 0.0 }
  0xcb   :  { %v149_v30 = vmul.f32 %v588_v28, %v588_v28  ;;  %v151_v35 = vmul.f32 %v592_v29, %v592_v29 }
  0xcc   :  { %v118_v31 = vsub.f32 %v51_v2, %v102_v26  ;;  %v120_v32 = vsub.f32 %v53_v3, %v104_v27 }
  0xcd   :  { %165 = vadd.xlane.f32.xlu0 %v149_v30  ;;  %v78_v33 = vpop.xlane.xlu0 %77  ;;  %v80_v34 = vpop.xlane.xlu1 %79 }
  0xce   :  { %v105_v36 = vmul.f32 0.03125, %v78_v33  ;;  %v106_v37 = vmul.f32 0.03125, %v80_v34  ;;  %v600_v38 = vsel %vm68_vm0, %v118_v31, 0.0  ;;  %v604_v39 = vsel %vm68_vm0, %v120_v32, 0.0 }
  0xcf   :  { %v150_v40 = vmul.f32 %v600_v38, %v600_v38  ;;  %v152_v45 = vmul.f32 %v604_v39, %v604_v39 }
  0xd0   :  { %v121_v41 = vsub.f32 %v54_v4, %v105_v36  ;;  %v122_v42 = vsub.f32 %v55_v5, %v106_v37 }
  0xd1   :  { %169 = vadd.xlane.f32.xlu0 %v151_v35  ;;  %167 = vadd.xlane.f32.xlu1 %v150_v40  ;;  %v82_v43 = vpop.xlane.xlu0 %81  ;;  %v84_v44 = vpop.xlane.xlu1 %83 }
  0xd2   :  { %v107_v46 = vmul.f32 0.03125, %v82_v43  ;;  %v108_v47 = vmul.f32 0.03125, %v84_v44  ;;  %v612_v48 = vsel %vm68_vm0, %v121_v41, 0.0  ;;  %v616_v49 = vsel %vm68_vm0, %v122_v42, 0.0 }
  0xd3   :  { %v153_v50 = vmul.f32 %v612_v48, %v612_v48  ;;  %v154_v55 = vmul.f32 %v616_v49, %v616_v49 }
  0xd4   :  { %v123_v51 = vsub.f32 %v553_v6, %v107_v46  ;;  %v124_v52 = vsub.f32 %v555_v7, %v108_v47 }
  0xd5   :  { %171 = vadd.xlane.f32.xlu1 %v152_v45  ;;  %173 = vadd.xlane.f32.xlu0 %v153_v50  ;;  %v86_v53 = vpop.xlane.xlu0 %85  ;;  %v88_v54 = vpop.xlane.xlu1 %87 }
  0xd6   :  { %v109_v56 = vmul.f32 0.03125, %v86_v53  ;;  %v110_v57 = vmul.f32 0.03125, %v88_v54  ;;  %v626_v58 = vsel %vm68_vm0, %v123_v51, 0.0  ;;  %v630_v59 = vsel %vm68_vm0, %v124_v52, 0.0 }
  0xd7   :  { %v155_v60 = vmul.f32 %v626_v58, %v626_v58  ;;  %v156_v1 = vmul.f32 %v630_v59, %v630_v59 }
  0xd8   :  { %v125_v61 = vsub.f32 %v559_v8, %v109_v56  ;;  %v126_v62 = vsub.f32 %v561_v9, %v110_v57 }
  0xd9   :  { %175 = vadd.xlane.f32.xlu1 %v154_v55  ;;  %177 = vadd.xlane.f32.xlu0 %v155_v60  ;;  %v90_v63 = vpop.xlane.xlu0 %89  ;;  %v92_v0 = vpop.xlane.xlu1 %91 }
  0xda   :  { %v111_v2 = vmul.f32 0.03125, %v90_v63  ;;  %v112_v3 = vmul.f32 0.03125, %v92_v0  ;;  %v640_v4 = vsel %vm68_vm0, %v125_v61, 0.0  ;;  %v644_v5 = vsel %vm68_vm0, %v126_v62, 0.0  ;;  %v695_v62 = vld [vmem:[%s764_s2] ss:$0 sm:$0xff] }
  0xdb   :  { %v157_v6 = vmul.f32 %v640_v4, %v640_v4  ;;  %v158_v18 = vmul.f32 %v644_v5, %v644_v5  ;;  %s494_s2 = smov [#allocation6]  }
  0xdc   :  { %v127_v7 = vsub.f32 %v565_v10, %v111_v2  ;;  %v128_v8 = vsub.f32 %v567_v11, %v112_v3 }
  0xdd   :  { %179 = vadd.xlane.f32.xlu1 %v156_v1  ;;  %181 = vadd.xlane.f32.xlu0 %v157_v6  ;;  %v94_v9 = vpop.xlane.xlu0 %93  ;;  %v96_v16 = vpop.xlane.xlu1 %95  ;;  %v701_v6 = vld [vmem:[%s765_s3] ss:$0 sm:$0xff]  ;;  %s328_s3 = sshll.u32 %s494_s2, 4  ;;  %s329_s3 = int_to_ptr.vmem [resolvable:$true] %s328_s3 }
  0xde   :  { %v113_v19 = vmul.f32 0.03125, %v94_v9  ;;  %v114_v20 = vmul.f32 0.03125, %v96_v16  ;;  %v654_v21 = vsel %vm68_vm0, %v127_v7, 0.0  ;;  %v658_v22 = vsel %vm68_vm0, %v128_v8, 0.0  ;;  %s448_s20 = scalar_lea.vmem %s329_s3, 2048  ;;  %p453_p4 = scmp.lt.s32.totalorder %s329_s3, %s329_s3 }
  0xdf   :  { %v159_v10 = vmul.f32 %v654_v21, %v654_v21  ;;  %v160_v26 = vmul.f32 %v658_v22, %v658_v22  ;;  %p449_p3 = scmp.ne.s32.totalorder %s329_s3, %s448_s20  ;;  %p454_p5 = scmp.lt.s32.totalorder %s448_s20, %s448_s20 }
  0xe0   :  { %v129_v11 = vsub.f32 %v571_v12, %v113_v19  ;;  %v130_v23 = vsub.f32 %v573_v13, %v114_v20 }
  0xe1   :  { %183 = vadd.xlane.f32.xlu1 %v158_v18  ;;  %185 = vadd.xlane.f32.xlu0 %v159_v10  ;;  %v98_v24 = vpop.xlane.xlu0 %97  ;;  %v100_v25 = vpop.xlane.xlu1 %99  ;;  %p455_p6 = por %p454_p5, %p453_p4 }
  0xe2   :  { %v115_v27 = vmul.f32 0.03125, %v98_v24  ;;  %v116_v30 = vmul.f32 0.03125, %v100_v25  ;;  %v668_v31 = vsel %vm68_vm0, %v129_v11, 0.0  ;;  %v672_v32 = vsel %vm68_vm0, %v130_v23, 0.0 }
  0xe3   :  { %v161_v12 = vmul.f32 %v668_v31, %v668_v31  ;;  %v162_v34 = vmul.f32 %v672_v32, %v672_v32  ;;  %p456_p7 = pnand %p455_p6, %p449_p3 }
  0xe4   :  { %v131_v13 = vsub.f32 %v577_v14, %v115_v27  ;;  %v132_v33 = vsub.f32 %v579_v15, %v116_v30 }
  0xe5   :  { %187 = vadd.xlane.f32.xlu1 %v160_v26  ;;  %189 = vadd.xlane.f32.xlu0 %v161_v12 }
  0xe6   :  { %v682_v35 = vsel %vm68_vm0, %v131_v13, 0.0  ;;  %v686_v36 = vsel %vm68_vm0, %v132_v33, 0.0 }
  0xe7   :  { %v163_v37 = vmul.f32 %v682_v35, %v682_v35  ;;  %v164_v14 = vmul.f32 %v686_v36, %v686_v36 }
  0xe9   :  { %191 = vadd.xlane.f32.xlu1 %v162_v34  ;;  %193 = vadd.xlane.f32.xlu0 %v163_v37 }
  0xed   :  { %195 = vadd.xlane.f32.xlu1 %v164_v14 }
 0x15a   :  { %v166_v15 = vpop.xlane.xlu0 %165 }
 0x15b   :  { %v197_v40 = vmul.f32 0.03125, %v166_v15 }
 0x15d   :  { %v213_v41 = vadd.f32 1e-05, %v197_v40 }
 0x15e   :  { %v168_v42 = vpop.xlane.xlu1 %167  ;;  %v170_v43 = vpop.xlane.xlu0 %169 }
 0x15f   :  { %382 = vrsqrt.f32 %v213_v41  ;;  %v198_v44 = vmul.f32 0.03125, %v168_v42  ;;  %v199_v45 = vmul.f32 0.03125, %v170_v43 }
 0x161   :  { %v214_v17 = vadd.f32 1e-05, %v198_v44  ;;  %v215_v46 = vadd.f32 1e-05, %v199_v45 }
 0x162   :  { %v172_v47 = vpop.xlane.xlu1 %171  ;;  %v174_v50 = vpop.xlane.xlu0 %173 }
 0x163   :  { %384 = vrsqrt.f32 %v214_v17  ;;  %v200_v51 = vmul.f32 0.03125, %v172_v47  ;;  %v201_v52 = vmul.f32 0.03125, %v174_v50 }
 0x164   :  { %386 = vrsqrt.f32 %v215_v46 }
 0x165   :  { %v216_v53 = vadd.f32 1e-05, %v200_v51  ;;  %v217_v54 = vadd.f32 1e-05, %v201_v52 }
 0x166   :  { %v176_v55 = vpop.xlane.xlu1 %175  ;;  %v178_v56 = vpop.xlane.xlu0 %177 }
 0x167   :  { %388 = vrsqrt.f32 %v216_v53  ;;  %v202_v57 = vmul.f32 0.03125, %v176_v55  ;;  %v203_v60 = vmul.f32 0.03125, %v178_v56 }
 0x168   :  { %390 = vrsqrt.f32 %v217_v54 }
 0x169   :  { %v383_v61 = vpop.eup %382  ;;  %v218_v63 = vadd.f32 1e-05, %v202_v57  ;;  %v219_v0 = vadd.f32 1e-05, %v203_v60 }
 0x16a   :  { %v245_v1 = vmul.f32 %v383_v61, %v588_v28  ;;  %v180_v2 = vpop.xlane.xlu1 %179  ;;  %v182_v3 = vpop.xlane.xlu0 %181 }
 0x16b   :  { %392 = vrsqrt.f32 %v218_v63  ;;  %v204_v7 = vmul.f32 0.03125, %v180_v2  ;;  %v205_v8 = vmul.f32 0.03125, %v182_v3 }
 0x16c   :  { %v268_v9 = vmul.f32 %v695_v62, %v245_v1  ;;  %394 = vrsqrt.f32 %v219_v0 }
 0x16d   :  { %v385_v16 = vpop.eup %384  ;;  %v220_v18 = vadd.f32 1e-05, %v204_v7  ;;  %v221_v19 = vadd.f32 1e-05, %v205_v8 }
 0x16e   :  { %v387_v20 = vpop.eup %386  ;;  %v291_v10 = vadd.f32 %v701_v6, %v268_v9  ;;  %v246_v28 = vmul.f32 %v385_v16, %v600_v38  ;;  %v184_v11 = vpop.xlane.xlu1 %183 }
 0x16f   :  { %v186_v23 = vpop.xlane.xlu0 %185  ;;  %v247_v24 = vmul.f32 %v387_v20, %v592_v29  ;;  %396 = vrsqrt.f32 %v220_v18  ;;  %v206_v25 = vmul.f32 0.03125, %v184_v11 }
 0x170   :  { %v207_v26 = vmul.f32 0.03125, %v186_v23  ;;  %307 = vst [vmem:[#allocation6] sm:$0xff] %v291_v10  ;;  %v269_v27 = vmul.f32 %v695_v62, %v246_v28  ;;  %398 = vrsqrt.f32 %v221_v19 }
 0x171   :  { %v389_v30 = vpop.eup %388  ;;  %v270_v12 = vmul.f32 %v695_v62, %v247_v24  ;;  %v222_v13 = vadd.f32 1e-05, %v206_v25 }
 0x172   :  { %v223_v33 = vadd.f32 1e-05, %v207_v26  ;;  %v391_v34 = vpop.eup %390  ;;  %v292_v37 = vadd.f32 %v701_v6, %v269_v27  ;;  %v248_v38 = vmul.f32 %v389_v30, %v604_v39  ;;  %v188_v14 = vpop.xlane.xlu1 %187 }
 0x173   :  { %v190_v15 = vpop.xlane.xlu0 %189  ;;  %v293_v29 = vadd.f32 %v701_v6, %v270_v12  ;;  %v249_v40 = vmul.f32 %v391_v34, %v612_v48  ;;  %400 = vrsqrt.f32 %v222_v13  ;;  %v208_v41 = vmul.f32 0.03125, %v188_v14 }
 0x174   :  { %308 = vst [vmem:[#allocation6 + $0x8] sm:$0xff] %v292_v37  ;;  %v271_v42 = vmul.f32 %v695_v62, %v248_v38  ;;  %402 = vrsqrt.f32 %v223_v33  ;;  %v209_v43 = vmul.f32 0.03125, %v190_v15 }
 0x175   :  { %v393_v44 = vpop.eup %392  ;;  %309 = vst [vmem:[#allocation6 + $0x10] sm:$0xff] %v293_v29  ;;  %v272_v45 = vmul.f32 %v695_v62, %v249_v40  ;;  %v224_v17 = vadd.f32 1e-05, %v208_v41 }
 0x176   :  { %v395_v46 = vpop.eup %394  ;;  %v294_v39 = vadd.f32 %v701_v6, %v271_v42  ;;  %v250_v47 = vmul.f32 %v393_v44, %v616_v49  ;;  %v225_v50 = vadd.f32 1e-05, %v209_v43  ;;  %v192_v51 = vpop.xlane.xlu1 %191 }
 0x177   :  { %v194_v48 = vpop.xlane.xlu0 %193  ;;  %v295_v52 = vadd.f32 %v701_v6, %v272_v45  ;;  %v251_v53 = vmul.f32 %v395_v46, %v626_v58  ;;  %404 = vrsqrt.f32 %v224_v17  ;;  %v210_v54 = vmul.f32 0.03125, %v192_v51 }
 0x178   :  { %310 = vst [vmem:[#allocation6 + $0x18] sm:$0xff] %v294_v39  ;;  %v273_v55 = vmul.f32 %v695_v62, %v250_v47  ;;  %406 = vrsqrt.f32 %v225_v50  ;;  %v211_v56 = vmul.f32 0.03125, %v194_v48 }
 0x179   :  { %v397_v57 = vpop.eup %396  ;;  %311 = vst [vmem:[#allocation6 + $0x20] sm:$0xff] %v295_v52  ;;  %v274_v60 = vmul.f32 %v695_v62, %v251_v53  ;;  %v226_v61 = vadd.f32 1e-05, %v210_v54 }
 0x17a   :  { %v399_v49 = vpop.eup %398  ;;  %v296_v63 = vadd.f32 %v701_v6, %v273_v55  ;;  %v252_v0 = vmul.f32 %v397_v57, %v630_v59  ;;  %v227_v1 = vadd.f32 1e-05, %v211_v56  ;;  %v196_v2 = vpop.xlane.xlu1 %195 }
 0x17b   :  { %v297_v58 = vadd.f32 %v701_v6, %v274_v60  ;;  %v253_v3 = vmul.f32 %v399_v49, %v640_v4  ;;  %408 = vrsqrt.f32 %v226_v61  ;;  %v212_v7 = vmul.f32 0.03125, %v196_v2 }
 0x17c   :  { %312 = vst [vmem:[#allocation6 + $0x28] sm:$0xff] %v296_v63  ;;  %v275_v8 = vmul.f32 %v695_v62, %v252_v0  ;;  %410 = vrsqrt.f32 %v227_v1 }
 0x17d   :  { %v401_v9 = vpop.eup %400  ;;  %313 = vst [vmem:[#allocation6 + $0x30] sm:$0xff] %v297_v58  ;;  %v276_v16 = vmul.f32 %v695_v62, %v253_v3  ;;  %v228_v18 = vadd.f32 1e-05, %v212_v7 }
 0x17e   :  { %v403_v19 = vpop.eup %402  ;;  %v298_v59 = vadd.f32 %v701_v6, %v275_v8  ;;  %v254_v20 = vmul.f32 %v401_v9, %v644_v5 }
 0x17f   :  { %v299_v10 = vadd.f32 %v701_v6, %v276_v16  ;;  %v255_v4 = vmul.f32 %v403_v19, %v654_v21  ;;  %412 = vrsqrt.f32 %v228_v18 }
 0x180   :  { %314 = vst [vmem:[#allocation6 + $0x38] sm:$0xff] %v298_v59  ;;  %v277_v28 = vmul.f32 %v695_v62, %v254_v20 }
 0x181   :  { %v405_v11 = vpop.eup %404  ;;  %315 = vst [vmem:[#allocation6 + $0x40] sm:$0xff] %v299_v10  ;;  %v278_v23 = vmul.f32 %v695_v62, %v255_v4 }
 0x182   :  { %v407_v24 = vpop.eup %406  ;;  %v300_v25 = vadd.f32 %v701_v6, %v277_v28  ;;  %v256_v26 = vmul.f32 %v405_v11, %v658_v22 }
 0x183   :  { %v301_v27 = vadd.f32 %v701_v6, %v278_v23  ;;  %v257_v5 = vmul.f32 %v407_v24, %v668_v31 }
 0x184   :  { %316 = vst [vmem:[#allocation6 + $0x48] sm:$0xff] %v300_v25  ;;  %v279_v21 = vmul.f32 %v695_v62, %v256_v26 }
 0x185   :  { %v409_v30 = vpop.eup %408  ;;  %317 = vst [vmem:[#allocation6 + $0x50] sm:$0xff] %v301_v27  ;;  %v280_v12 = vmul.f32 %v695_v62, %v257_v5 }
 0x186   :  { %v411_v13 = vpop.eup %410  ;;  %v302_v33 = vadd.f32 %v701_v6, %v279_v21  ;;  %v258_v34 = vmul.f32 %v409_v30, %v672_v32 }
 0x187   :  { %v303_v37 = vadd.f32 %v701_v6, %v280_v12  ;;  %v259_v22 = vmul.f32 %v411_v13, %v682_v35 }
 0x188   :  { %318 = vst [vmem:[#allocation6 + $0x58] sm:$0xff] %v302_v33  ;;  %v281_v38 = vmul.f32 %v695_v62, %v258_v34 }
 0x189   :  { %v413_v31 = vpop.eup %412  ;;  %319 = vst [vmem:[#allocation6 + $0x60] sm:$0xff] %v303_v37  ;;  %v282_v14 = vmul.f32 %v695_v62, %v259_v22 }
 0x18a   :  { %v304_v15 = vadd.f32 %v701_v6, %v281_v38  ;;  %v260_v29 = vmul.f32 %v413_v31, %v686_v36 }
 0x18b   :  { %v305_v40 = vadd.f32 %v701_v6, %v282_v14 }
 0x18c   :  { %320 = vst [vmem:[#allocation6 + $0x68] sm:$0xff] %v304_v15  ;;  %v283_v32 = vmul.f32 %v695_v62, %v260_v29 }
 0x18d   :  { %321 = vst [vmem:[#allocation6 + $0x70] sm:$0xff] %v305_v40 }
 0x18e   :  { %v306_v35 = vadd.f32 %v701_v6, %v283_v32 }
 0x190   :  { %322 = vst [vmem:[#allocation6 + $0x78] sm:$0xff] %v306_v35 }
 0x191   :  { %459 = shalt.err (!%p456_p7)
}
 0x192   :  { %s460_s23 = scalar_lea.hbm %s766_s4, 2048 }
 0x193   :  { %p461_p8 = scmp.ne.s32.totalorder %s766_s4, %s460_s23  ;;  %p464_p9 = scmp.lt.u32.totalorder %s460_s23, %s766_s4 }
 0x195   :  { %p466_p10 = pnand %p464_p9, %p461_p8 }
 0x197   :  { %469 = shalt.err (!%p466_p10)
}
 0x198   :  { %s495_s28 = smov 128   ;;  %s496_s29 = smov 8  }
 0x199   :  { %334 = dma.vmem_to_hbm [thread:$0]  %s329_s3, 2048, %s766_s4, [#allocation7], %s495_s28, %s495_s28, %s496_s29  }
 0x19a   :  { %482 = dma.done.wait [#allocation7], 2048  }
 0x19b   :  { %483 = vsyncadd [#allocation7], 4294965248 }
 0x19c   :  { %338 = vsyncpa [#allocation7], 1 }
 0x19d   :  { %339 = vsyncmov [#allocation3] }
 0x1a0   :  { %s340_s5 = vpop.sfrf %339 }
 0x1a1   :  { %p361_p11 = scmp.ne.s32.totalorder %s340_s5, 0 }
 0x1a3   :  { %344 = shalt.err (%p361_p11)  }

</bundles_post_ra>
